<compile_context>
chip_gen: v5e
topology: v5e:2x2
jax: 0.10.0
libtpu: 0.0.40
codegen_flags: <defaults>
</compile_context>

<pallas_src>
import jax
import jax.numpy as jnp
from jax.experimental import pallas as pl
from jax.experimental.pallas import tpu as pltpu

OBS_DIM = 16         # input feature size of the preprocess Net
HIDDEN = 128         # tianshou MLP hidden width -> 128 features
ACTION_DIM = 8       # np.prod(action_shape)
PAD_ACTION = 128     # action head padded to a full lane width (compute only)
NEG_LARGE = -1e30    # pad-column bias -> exp() underflows to exactly 0


def _round_up(x, m):
    return (x + m - 1) // m * m


def actor_kernel(s_ref, w1_ref, b1_ref, w2_ref, b2_ref, w3_ref, b3_ref, probs_ref):
    """One batch tile: MLP(16->128->128) with ReLU, padded action head, softmax."""
    wdt = w1_ref.dtype

    # --- preprocess net: Linear -> ReLU -> Linear -> ReLU (f32 accumulation) ---
    h1 = jnp.dot(s_ref[...].astype(wdt), w1_ref[...],
                 preferred_element_type=jnp.float32)
    h1 = jnp.maximum(h1 + b1_ref[...], 0.0)

    h2 = jnp.dot(h1.astype(wdt), w2_ref[...],
                 preferred_element_type=jnp.float32)
    h2 = jnp.maximum(h2 + b2_ref[...], 0.0)

    # --- last Linear(128, A) computed on a 128-lane padded slab + stable softmax ---
    # Padded columns: zero weights + (-1e30) f32 bias -> exp()==0, so the softmax
    # over the real ACTION_DIM columns is numerically identical.
    z = jnp.dot(h2.astype(wdt), w3_ref[...],
                preferred_element_type=jnp.float32) + b3_ref[...]
    z = z - jnp.max(z, axis=-1, keepdims=True)
    e = jnp.exp(z)
    p = e / jnp.sum(e, axis=-1, keepdims=True)   # exact reciprocal (rows sum to 1)
    # Store only the real action columns (narrow output block -> 16x less writeback).
    probs_ref[...] = p[:, :ACTION_DIM]


def actor_forward(s, params, state=None, *, block_rows=8192):
    """Mirrors Actor.forward: returns (softmax probs over actions, state)."""
    w1, b1, w2, b2, w3p, b3p = params
    batch = s.shape[0]

    # Near-equal batch tiles (multiple of 8 sublanes), capped at block_rows.
    n_tiles = max(pl.cdiv(batch, block_rows), 1)
    if batch >= 16:
        # v7x: keep >= 2 grid tiles so the "parallel" axis shards across both
        # TensorCores (harmless on single-TC v5e/v6e).
        n_tiles = max(n_tiles, 2)
    tb = _round_up(pl.cdiv(batch, n_tiles), 8)
    batch_pad = n_tiles * tb
    if batch_pad != batch:
        s = jnp.pad(s, ((0, batch_pad - batch), (0, 0)))
    grid = (n_tiles,)

    wbytes = sum(int(a.size * a.dtype.itemsize) for a in (w1, b1, w2, b2, w3p, b3p))
    cost = pl.CostEstimate(
        flops=2 * batch_pad * (OBS_DIM * HIDDEN + HIDDEN * HIDDEN + HIDDEN * PAD_ACTION),
        transcendentals=batch_pad * PAD_ACTION,
        bytes_accessed=int(s.size * s.dtype.itemsize) + wbytes
                       + batch_pad * ACTION_DIM * 4,
    )

    def rows(i):          # batch-tiled arrays
        return (i, 0)

    def whole(i):         # resident weights / biases (constant block index)
        return (0, 0)

    probs_pad = pl.pallas_call(
        actor_kernel,
        out_shape=jax.ShapeDtypeStruct((batch_pad, ACTION_DIM), jnp.float32),
        grid=grid,
        in_specs=[
            pl.BlockSpec((tb, OBS_DIM), rows),
            pl.BlockSpec(w1.shape, whole),
            pl.BlockSpec(b1.shape, whole),
            pl.BlockSpec(w2.shape, whole),
            pl.BlockSpec(b2.shape, whole),
            pl.BlockSpec(w3p.shape, whole),
            pl.BlockSpec(b3p.shape, whole),
        ],
        # Narrow output: last block dim == full array dim (legal), no wrapper
        # column-slice pass and 16x fewer output bytes than the padded slab.
        out_specs=pl.BlockSpec((tb, ACTION_DIM), rows),
        compiler_params=pltpu.CompilerParams(
            dimension_semantics=("parallel",),        # shard batch tiles across TCs
            vmem_limit_bytes=32 * 1024 * 1024,        # big tiles legal on v5e too
        ),
        cost_estimate=cost,
    )(s, w1, b1, w2, b2, w3p, b3p)

    # Only trim batch padding (no column slice needed anymore).
    probs = probs_pad if batch_pad == batch else probs_pad[:batch]
    # tianshou's Net forwards `state` unchanged (h == state, None here).
    return probs, state


def actor_reference(s, params):
    """Pure-JAX reference using the same padded weights / math path."""
    w1, b1, w2, b2, w3p, b3p = params
    wdt = w1.dtype
    h1 = jnp.maximum(
        jnp.dot(s.astype(wdt), w1, preferred_element_type=jnp.float32) + b1, 0.0)
    h2 = jnp.maximum(
        jnp.dot(h1.astype(wdt), w2, preferred_element_type=jnp.float32) + b2, 0.0)
    z = jnp.dot(h2.astype(wdt), w3p, preferred_element_type=jnp.float32) + b3p
    return jax.nn.softmax(z, axis=-1)[:, :ACTION_DIM]


def init_params(key, weight_dtype=jnp.bfloat16):
    k1, k2, k3 = jax.random.split(key, 3)
    # Deterministic synthetic weights (not a checkpoint load). bf16 weights are
    # an intentional precision choice (~1e-2 logit drift vs an f32 checkpoint).
    w1 = (jax.random.normal(k1, (OBS_DIM, HIDDEN), jnp.float32) * 0.1).astype(weight_dtype)
    b1 = jnp.zeros((1, HIDDEN), jnp.float32)
    w2 = (jax.random.normal(k2, (HIDDEN, HIDDEN), jnp.float32) * 0.1).astype(weight_dtype)
    b2 = jnp.zeros((1, HIDDEN), jnp.float32)
    w3 = (jax.random.normal(k3, (HIDDEN, ACTION_DIM), jnp.float32) * 0.1).astype(weight_dtype)
    b3 = jnp.zeros((1, ACTION_DIM), jnp.float32)
    # Pad the 8-wide action head to a full 128-lane compute slab: zero weight
    # columns and -1e30 f32 bias so padded logits contribute exp() == 0.
    w3p = jnp.zeros((HIDDEN, PAD_ACTION), weight_dtype).at[:, :ACTION_DIM].set(w3)
    b3p = jnp.full((1, PAD_ACTION), NEG_LARGE, jnp.float32).at[:, :ACTION_DIM].set(b3)
    return (w1, b1, w2, b2, w3p, b3p)


if __name__ == "__main__":
    key = jax.random.PRNGKey(0)
    pkey, skey = jax.random.split(key)
    params = init_params(pkey)

    batch = 2
    s = jax.random.normal(skey, (batch, OBS_DIM), jnp.float32)

    probs, h = actor_forward(s, params, state=None)
    probs = jax.block_until_ready(probs)

    # sanity: shape, softmax rows sum to 1 (exact reciprocal -> tight tol),
    # state passthrough, and match against a pure-JAX reference.
    assert probs.shape == (batch, ACTION_DIM)
    assert jnp.allclose(jnp.sum(probs, axis=-1), 1.0, atol=1e-5)
    assert h is None
    ref = actor_reference(s, params)
    assert jnp.allclose(probs, ref, atol=1e-4)

    # also exercise a batch that forces >= 2 grid tiles and batch padding
    big = 72
    s_big = jax.random.normal(skey, (big, OBS_DIM), jnp.float32)
    probs_big, _ = actor_forward(s_big, params, state=None, block_rows=64)
    probs_big = jax.block_until_ready(probs_big)
    assert probs_big.shape == (big, ACTION_DIM)
    assert jnp.allclose(probs_big, actor_reference(s_big, params), atol=1e-4)

    print("KERNEL_OK")
</pallas_src>

<mosaic_0001>
module attributes {stable_mosaic.version = 11 : i64} {
  func.func @actor_kernel(%arg0: i32, %arg1: memref<8x16xf32, #tpu.memory_space<vmem>>, %arg2: memref<16x128xbf16, #tpu.memory_space<vmem>>, %arg3: memref<1x128xf32, #tpu.memory_space<vmem>>, %arg4: memref<128x128xbf16, #tpu.memory_space<vmem>>, %arg5: memref<1x128xf32, #tpu.memory_space<vmem>>, %arg6: memref<128x128xbf16, #tpu.memory_space<vmem>>, %arg7: memref<1x128xf32, #tpu.memory_space<vmem>>, %arg8: memref<8x8xf32, #tpu.memory_space<vmem>>) attributes {dimension_semantics = [#tpu.dimension_semantics<parallel>], iteration_bounds = array<i64: 1>, scalar_prefetch = 0 : i64, scratch_operands = 0 : i64, tpu.core_type = #tpu.core_type<tc>, window_params = [{transform_indices = @transform_0, window_bounds = array<i64: 8, 16>}, {pipeline_mode = #tpu.pipeline_mode<synchronous>, transform_indices = @transform_1, window_bounds = array<i64: 16, 128>}, {pipeline_mode = #tpu.pipeline_mode<synchronous>, transform_indices = @transform_2, window_bounds = array<i64: 1, 128>}, {pipeline_mode = #tpu.pipeline_mode<synchronous>, transform_indices = @transform_3, window_bounds = array<i64: 128, 128>}, {pipeline_mode = #tpu.pipeline_mode<synchronous>, transform_indices = @transform_4, window_bounds = array<i64: 1, 128>}, {pipeline_mode = #tpu.pipeline_mode<synchronous>, transform_indices = @transform_5, window_bounds = array<i64: 128, 128>}, {pipeline_mode = #tpu.pipeline_mode<synchronous>, transform_indices = @transform_6, window_bounds = array<i64: 1, 128>}, {transform_indices = @transform_7, window_bounds = array<i64: 8, 8>}]} {
    %c0 = arith.constant 0 : index
    %c0_0 = arith.constant 0 : index
    %0 = vector.load %arg1[%c0, %c0_0] : memref<8x16xf32, #tpu.memory_space<vmem>>, vector<8x16xf32>
    %1 = arith.truncf %0 : vector<8x16xf32> to vector<8x16xbf16>
    %c0_1 = arith.constant 0 : index
    %c0_2 = arith.constant 0 : index
    %2 = vector.load %arg2[%c0_1, %c0_2] : memref<16x128xbf16, #tpu.memory_space<vmem>>, vector<16x128xbf16>
    %cst = arith.constant dense<0.000000e+00> : vector<8x128xf32>
    %3 = tpu.matmul %1, %2, %cst {dimension_numbers = #tpu.dot_dimension_numbers<[1], [0], [0], [1], [0, 0, 1, 1], [], []>} : vector<8x16xbf16>, vector<16x128xbf16>, vector<8x128xf32> -> vector<8x128xf32>
    %c0_3 = arith.constant 0 : index
    %c0_4 = arith.constant 0 : index
    %4 = vector.load %arg3[%c0_3, %c0_4] : memref<1x128xf32, #tpu.memory_space<vmem>>, vector<1x128xf32>
    %5 = vector.broadcast %4 : vector<1x128xf32> to vector<8x128xf32>
    %6 = arith.addf %3, %5 : vector<8x128xf32>
    %cst_5 = arith.constant 0.000000e+00 : f32
    %7 = vector.broadcast %cst_5 : f32 to vector<8x128xf32>
    %8 = arith.maximumf %6, %7 : vector<8x128xf32>
    %9 = arith.truncf %8 : vector<8x128xf32> to vector<8x128xbf16>
    %c0_6 = arith.constant 0 : index
    %c0_7 = arith.constant 0 : index
    %10 = vector.load %arg4[%c0_6, %c0_7] : memref<128x128xbf16, #tpu.memory_space<vmem>>, vector<128x128xbf16>
    %cst_8 = arith.constant dense<0.000000e+00> : vector<8x128xf32>
    %11 = tpu.matmul %9, %10, %cst_8 {dimension_numbers = #tpu.dot_dimension_numbers<[1], [0], [0], [1], [0, 0, 1, 1], [], []>} : vector<8x128xbf16>, vector<128x128xbf16>, vector<8x128xf32> -> vector<8x128xf32>
    %c0_9 = arith.constant 0 : index
    %c0_10 = arith.constant 0 : index
    %12 = vector.load %arg5[%c0_9, %c0_10] : memref<1x128xf32, #tpu.memory_space<vmem>>, vector<1x128xf32>
    %13 = vector.broadcast %12 : vector<1x128xf32> to vector<8x128xf32>
    %14 = arith.addf %11, %13 : vector<8x128xf32>
    %cst_11 = arith.constant 0.000000e+00 : f32
    %15 = vector.broadcast %cst_11 : f32 to vector<8x128xf32>
    %16 = arith.maximumf %14, %15 : vector<8x128xf32>
    %17 = arith.truncf %16 : vector<8x128xf32> to vector<8x128xbf16>
    %c0_12 = arith.constant 0 : index
    %c0_13 = arith.constant 0 : index
    %18 = vector.load %arg6[%c0_12, %c0_13] : memref<128x128xbf16, #tpu.memory_space<vmem>>, vector<128x128xbf16>
    %cst_14 = arith.constant dense<0.000000e+00> : vector<8x128xf32>
    %19 = tpu.matmul %17, %18, %cst_14 {dimension_numbers = #tpu.dot_dimension_numbers<[1], [0], [0], [1], [0, 0, 1, 1], [], []>} : vector<8x128xbf16>, vector<128x128xbf16>, vector<8x128xf32> -> vector<8x128xf32>
    %c0_15 = arith.constant 0 : index
    %c0_16 = arith.constant 0 : index
    %20 = vector.load %arg7[%c0_15, %c0_16] : memref<1x128xf32, #tpu.memory_space<vmem>>, vector<1x128xf32>
    %21 = vector.broadcast %20 : vector<1x128xf32> to vector<8x128xf32>
    %22 = arith.addf %19, %21 : vector<8x128xf32>
    %cst_17 = arith.constant dense<0xFF800000> : vector<8xf32>
    %23 = vector.multi_reduction <maximumf>, %22, %cst_17 [1] : vector<8x128xf32> to vector<8xf32>
    %24 = vector.shape_cast %23 : vector<8xf32> to vector<8x1xf32>
    %25 = vector.broadcast %24 : vector<8x1xf32> to vector<8x128xf32>
    %26 = arith.subf %22, %25 : vector<8x128xf32>
    %27 = math.exp %26 : vector<8x128xf32>
    %cst_18 = arith.constant dense<0.000000e+00> : vector<8xf32>
    %28 = vector.multi_reduction <add>, %27, %cst_18 [1] : vector<8x128xf32> to vector<8xf32>
    %29 = vector.shape_cast %28 : vector<8xf32> to vector<8x1xf32>
    %30 = vector.broadcast %29 : vector<8x1xf32> to vector<8x128xf32>
    %31 = arith.divf %27, %30 : vector<8x128xf32>
    %32 = vector.extract_strided_slice %31 {offsets = [0, 0], sizes = [8, 8], strides = [1, 1]} : vector<8x128xf32> to vector<8x8xf32>
    %c0_19 = arith.constant 0 : index
    %c0_20 = arith.constant 0 : index
    %33 = vector.load %arg8[%c0_19, %c0_20] : memref<8x8xf32, #tpu.memory_space<vmem>>, vector<8x8xf32>
    tpu.vector_store %arg8[%c0_19, %c0_20], %32 {strides = array<i32>} : memref<8x8xf32, #tpu.memory_space<vmem>>, vector<8x8xf32>,
    return
  }
  func.func @transform_0(%arg0: i32) -> (i32, i32) {
    %c0_i32 = arith.constant 0 : i32
    %c0_i32_0 = arith.constant 0 : i32
    return %arg0, %c0_i32 : i32, i32
  }
  func.func @transform_1(%arg0: i32) -> (i32, i32) {
    %c0_i32 = arith.constant 0 : i32
    %c0_i32_0 = arith.constant 0 : i32
    %c0_i32_1 = arith.constant 0 : i32
    return %c0_i32, %c0_i32_0 : i32, i32
  }
  func.func @transform_2(%arg0: i32) -> (i32, i32) {
    %c0_i32 = arith.constant 0 : i32
    %c0_i32_0 = arith.constant 0 : i32
    %c0_i32_1 = arith.constant 0 : i32
    return %c0_i32, %c0_i32_0 : i32, i32
  }
  func.func @transform_3(%arg0: i32) -> (i32, i32) {
    %c0_i32 = arith.constant 0 : i32
    %c0_i32_0 = arith.constant 0 : i32
    %c0_i32_1 = arith.constant 0 : i32
    return %c0_i32, %c0_i32_0 : i32, i32
  }
  func.func @transform_4(%arg0: i32) -> (i32, i32) {
    %c0_i32 = arith.constant 0 : i32
    %c0_i32_0 = arith.constant 0 : i32
    %c0_i32_1 = arith.constant 0 : i32
    return %c0_i32, %c0_i32_0 : i32, i32
  }
  func.func @transform_5(%arg0: i32) -> (i32, i32) {
    %c0_i32 = arith.constant 0 : i32
    %c0_i32_0 = arith.constant 0 : i32
    %c0_i32_1 = arith.constant 0 : i32
    return %c0_i32, %c0_i32_0 : i32, i32
  }
  func.func @transform_6(%arg0: i32) -> (i32, i32) {
    %c0_i32 = arith.constant 0 : i32
    %c0_i32_0 = arith.constant 0 : i32
    %c0_i32_1 = arith.constant 0 : i32
    return %c0_i32, %c0_i32_0 : i32, i32
  }
  func.func @transform_7(%arg0: i32) -> (i32, i32) {
    %c0_i32 = arith.constant 0 : i32
    %c0_i32_0 = arith.constant 0 : i32
    return %arg0, %c0_i32 : i32, i32
  }
}

</mosaic_0001>

<bundles_post_ra>
// kernel: tpu_custom_call.1
= control target key start
LH: loop header
LB: loop body
LE: loop exit
PB: predicated region body
PF: predicated region fallthrough
CT: control target
= control target key end

     0   :  { %12 = vsyncpa [#allocation3], 0  ;;  %s628_s0 = inlined_call_operand.hbm [shape: f32[8,16], index: 0, kind: input, shape index: {}]   ;;  %s629_s1 = inlined_call_operand.hbm [shape: bf16[16,128], index: 1, kind: input, shape index: {}]   ;;  %s630_s2 = inlined_call_operand.vmem [shape: f32[1,128], index: 2, kind: input, shape index: {}]   ;;  %s631_s3 = inlined_call_operand.hbm [shape: bf16[128,128], index: 3, kind: input, shape index: {}]   ;;  %s632_s4 = inlined_call_operand.vmem [shape: f32[1,128], index: 4, kind: input, shape index: {}]   ;;  %s633_s5 = inlined_call_operand.hbm [shape: bf16[128,128], index: 5, kind: input, shape index: {}]   ;;  %s634_s6 = inlined_call_operand.vmem [shape: f32[1,128], index: 6, kind: input, shape index: {}]   ;;  %s635_s7 = inlined_call_operand.hbm [shape: f32[8,8], index: 7, kind: output, shape index: {}]  }
   0x1   :  { %13 = vsyncpa [#allocation6], 0 }
   0x2   :  { %14 = vsyncpa [#allocation9], 0  ;;  %s31_s26 = sshll.u32 %s629_s1, 4  ;;  %s32_s26 = int_to_ptr.hbm [resolvable:$true] %s31_s26 }
   0x3   :  { %15 = vsyncpa [#allocation4], 0  ;;  %s557_s27 = smov [#allocation5]   ;;  %s21_s8 = sshll.u32 %s628_s0, 4  ;;  %s22_s8 = int_to_ptr.hbm [resolvable:$true] %s21_s8 }
   0x4   :  { %s33_s28 = sshll.u32 %s557_s27, 4  ;;  %s558_s9 = smov 64   ;;  %s34_s28 = int_to_ptr.vmem [resolvable:$true] %s33_s28 }
   0x5   :  { %s559_s10 = smov 4   ;;  %s560_s11 = smov [#allocation2]  }
   0x6   :  { %39 = dma.hbm_to_vmem [thread:$0]  %s32_s26, 128, %s34_s28, [#allocation6], %s558_s9, %s558_s9, %s559_s10  }
   0x7   :  { %s23_s12 = sshll.u32 %s560_s11, 4  ;;  %s46_s15 = sshll.u32 %s631_s3, 4  ;;  %s24_s12 = int_to_ptr.vmem [resolvable:$true] %s23_s12  ;;  %s47_s15 = int_to_ptr.hbm [resolvable:$true] %s46_s15 }
   0x8   :  { %26 = dma.hbm_to_vmem [thread:$0]  %s22_s8, 128, %s24_s12, [#allocation3]  }
   0x9   :  { %s61_s17 = sshll.u32 %s633_s5, 4  ;;  %s561_s18 = smov [#allocation7]   ;;  %s62_s17 = int_to_ptr.hbm [resolvable:$true] %s61_s17 }
   0xa   :  { %s48_s19 = sshll.u32 %s561_s18, 4  ;;  %s562_s0 = smov [#allocation8]   ;;  %s49_s19 = int_to_ptr.vmem [resolvable:$true] %s48_s19 }
   0xb   :  { %54 = dma.hbm_to_vmem [thread:$0]  %s47_s15, 1024, %s49_s19, [#allocation6], %s558_s9, %s558_s9, %s559_s10  }
   0xc   :  { %s63_s20 = sshll.u32 %s562_s0, 4  ;;  %s64_s20 = int_to_ptr.vmem [resolvable:$true] %s63_s20 }
   0xd   :  { %69 = dma.hbm_to_vmem [thread:$0]  %s62_s17, 1024, %s64_s20, [#allocation9], %s558_s9, %s558_s9, %s559_s10  }
   0xe   :  { %549 = dma.done.wait [#allocation3], 128  }
   0xf   :  { %550 = vsyncadd [#allocation3], 4294967168 }
  0x10   :  { %551 = dma.done.wait [#allocation6], 1152  }
  0x11   :  { %552 = vsyncadd [#allocation6], 4294966144 }
  0x12   :  { %553 = dma.done.wait [#allocation9], 1024  }
  0x13   :  { %554 = vsyncadd [#allocation9], 4294966272  ;;  %v398_v0 = vld [vmem:[#allocation5] sm:$0xff]  ;;  %v89_v1 = vld [vmem:[#allocation2] sm:$0xff]  ;;  %vm103_vm0 = vcmask 130048   ;;  %s317_s26 = sshll.u32 %s635_s7, 4  ;;  %s318_s26 = int_to_ptr.hbm [resolvable:$true] %s317_s26 }
  0x14   :  { %v406_v2 = vld [vmem:[#allocation7 + $0x38] sm:$0xff]  ;;  %v90_v3 = vpack.c.bf16 %v89_v1, %v89_v1  ;;  %114 = vmatpush.bf16.msra.mxu0 %v398_v0  ;;  %v405_v4 = vld [vmem:[#allocation7 + $0x30] sm:$0xff]  ;;  %v404_v5 = vld [vmem:[#allocation7 + $0x28] sm:$0xff]  ;;  %vm308_vm5 = vcmask 64512  }
  0x15   :  { %190 = vmatpush.bf16.msra.mxu1 %v406_v2  ;;  %v403_v6 = vld [vmem:[#allocation7 + $0x20] sm:$0xff]  ;;  %v402_v7 = vld [vmem:[#allocation7 + $0x18] sm:$0xff]  ;;  %v401_v8 = vld [vmem:[#allocation7 + $0x10] sm:$0xff] }
  0x16   :  { %v400_v9 = vld [vmem:[#allocation7 + $0x8] sm:$0xff]  ;;  %v399_v10 = vld [vmem:[#allocation7] sm:$0xff]  ;;  %v414_v11 = vld [vmem:[#allocation8 + $0x38] sm:$0xff] }
  0x17   :  { %333 = vmatmul.msk.bf16.vlgmr.msra.gmra.mxu0 %vm103_vm0, %v90_v3  ;;  %273 = vmatpush.bf16.msra.mxu2 %v414_v11  ;;  %v413_v12 = vld [vmem:[#allocation8 + $0x30] sm:$0xff]  ;;  %v412_v13 = vld [vmem:[#allocation8 + $0x28] sm:$0xff]  ;;  %v411_v14 = vld [vmem:[#allocation8 + $0x20] sm:$0xff] }
  0x18   :  { %v410_v15 = vld [vmem:[#allocation8 + $0x18] sm:$0xff]  ;;  %v409_v16 = vld [vmem:[#allocation8 + $0x10] sm:$0xff]  ;;  %v408_v23 = vld [vmem:[#allocation8 + $0x8] sm:$0xff] }
  0x19   :  { %191 = vmatpush.bf16.msra.mxu1 %v405_v4  ;;  %v422_v17 = vld [vmem:[%s630_s2] ss:$0 sm:$0xff]  ;;  %v407_v24 = vld [vmem:[#allocation8] sm:$0xff] }
  0x1a   :  { %v423_v25 = vld [vmem:[%s632_s4] ss:$0 sm:$0xff]  ;;  %s563_s4 = smov [#allocation10]  }
  0x1b   :  { %274 = vmatpush.bf16.msra.mxu2 %v413_v12  ;;  %v424_v31 = vld [vmem:[%s634_s6] ss:$0 sm:$0xff]  ;;  %s315_s6 = sshll.u32 %s563_s4, 4  ;;  %s316_s6 = int_to_ptr.vmem [resolvable:$true] %s315_s6 }
  0x1d   :  { %192 = vmatpush.bf16.msra.mxu1 %v404_v5 }
  0x1f   :  { %275 = vmatpush.bf16.msra.mxu2 %v412_v13 }
  0x21   :  { %193 = vmatpush.bf16.msra.mxu1 %v403_v6 }
  0x23   :  { %276 = vmatpush.bf16.msra.mxu2 %v411_v14 }
  0x25   :  { %194 = vmatpush.bf16.msra.mxu1 %v402_v7 }
  0x27   :  { %277 = vmatpush.bf16.msra.mxu2 %v410_v15 }
  0x29   :  { %195 = vmatpush.bf16.msra.mxu1 %v401_v8 }
  0x2b   :  { %278 = vmatpush.bf16.msra.mxu2 %v409_v16 }
  0x2d   :  { %196 = vmatpush.bf16.msra.mxu1 %v400_v9 }
  0x2f   :  { %279 = vmatpush.bf16.msra.mxu2 %v408_v23 }
  0x31   :  { %197 = vmatpush.bf16.msra.mxu1 %v399_v10 }
  0x33   :  { %280 = vmatpush.bf16.msra.mxu2 %v407_v24 }
  0x94   :  { %v116_v18 = vpop.f32.mrf.mxu0 }
  0x95   :  { %v117_v19 = vadd.f32 %v422_v17, %v116_v18 }
  0x97   :  { %v120_v20 = vmax.f32 %v117_v19, 0.0 }
  0x99   :  { %v121_v21 = vpack.c.bf16 %v120_v20, %v120_v20 }
  0x9b   :  { %198 = vmatmul.bf16.vlgmr.msra.gmra.mxu1 %v121_v21 }
  0x9c   :  { %v118_v22 = vpop.f32.mrf.mxu0 }
 0x118   :  { %v199_v26 = vpop.f32.mrf.mxu1 }
 0x119   :  { %v200_v27 = vadd.f32 %v423_v25, %v199_v26 }
 0x11b   :  { %v203_v28 = vmax.f32 %v200_v27, 0.0 }
 0x11d   :  { %v204_v29 = vpack.c.bf16 %v203_v28, %v203_v28 }
 0x11f   :  { %281 = vmatmul.bf16.vlgmr.msra.gmra.mxu2 %v204_v29 }
 0x120   :  { %v201_v30 = vpop.f32.mrf.mxu1 }
 0x1a2   :  { %v282_v32 = vpop.f32.mrf.mxu2 }
 0x1a3   :  { %v283_v33 = vadd.f32 %v424_v31, %v282_v32 }
 0x1a5   :  { %286 = vmax.xlane.f32.xlu0 %v283_v33 }
 0x1aa   :  { %v284_v34 = vpop.f32.mrf.mxu2 }
 0x218   :  { %v287_v35 = vpop.xlane.xlu0 %286 }
 0x219   :  { %v288_v36 = vsub.f32 %v283_v33, %v287_v35 }
 0x21b   :  { %v289_v37 = vmul.f32 1.442695, %v288_v36 }
 0x21d   :  { %425 = vpow2.f32 %v289_v37 }
 0x223   :  { %v426_v38 = vpop.eup %425 }
 0x224   :  { %291 = vadd.xlane.f32.xlu0 %v426_v38 }
 0x297   :  { %v292_v39 = vpop.xlane.xlu0 %291 }
 0x298   :  { %427 = vrcp.f32 %v292_v39  ;;  %v304_v43 = vand.u32 2147483648, %v292_v39  ;;  %v302_v45 = vand.u32 2147483647, %v292_v39  ;;  %vm298_vm2 = vweird.f32 %v292_v39 }
 0x29a   :  { %v305_v47 = vor.u32 1.1754944e-38, %v304_v43  ;;  %vm303_vm4 = vcmp.eq.f32.partialorder %v302_v45, 8.507059e+37 }
 0x29e   :  { %v428_v40 = vpop.eup %427 }
 0x29f   :  { %v294_v41 = vmul.f32 %v428_v40, %v292_v39  ;;  %vm299_vm1 = vweird.f32 %v428_v40 }
 0x2a0   :  { %vm300_vm3 = vmor %vm298_vm2, %vm299_vm1 }
 0x2a1   :  { %v295_v42 = vsub.f32 1.0, %v294_v41 }
 0x2a3   :  { %v296_v44 = vmul.f32 %v428_v40, %v295_v42 }
 0x2a5   :  { %v297_v46 = vadd.f32 %v428_v40, %v296_v44 }
 0x2a7   :  { %v301_v48 = vsel %vm300_vm3, %v428_v40, %v297_v46 }
 0x2a8   :  { %v306_v49 = vsel %vm303_vm4, %v305_v47, %v301_v48 }
 0x2a9   :  { %v307_v50 = vmul.f32 %v426_v38, %v306_v49 }
 0x2ab   :  { %309 = vst.msk [vmem:[#allocation10] sm:$0xff] %vm308_vm5, %v307_v50 }
 0x2ac   :  { %320 = dma.vmem_to_hbm [thread:$0]  %s316_s6, 128, %s318_s26, [#allocation4]  }
 0x2ad   :  { %555 = dma.done.wait [#allocation4], 128  }
 0x2ae   :  { %556 = vsyncadd [#allocation4], 4294967168 }
 0x2af   :  { %325 = vsyncpa [#allocation3], 1 }
 0x2b0   :  { %326 = vsyncpa [#allocation6], 1 }
 0x2b1   :  { %327 = vsyncpa [#allocation9], 1 }
 0x2b2   :  { %328 = vsyncpa [#allocation4], 1 }

</bundles_post_ra>
